<compile_context>
chip_gen: v5e
topology: v5e:2x2
jax: 0.10.0
libtpu: 0.0.40
codegen_flags: <defaults>
</compile_context>

<pallas_src>
import math

import jax
import jax.numpy as jnp
from jax.experimental import pallas as pl
from jax.experimental.pallas import tpu as pltpu


# ----------------------------- kernels ------------------------------------ #

def _posenc_kernel_2d(x_ref, pe_ref, o_ref):
    # x_ref / pe_ref / o_ref: (tS, B*D) — lane-dense add (pe pre-tiled over batch).
    o_ref[...] = x_ref[...] + pe_ref[...]


def _posenc_kernel_3d(x_ref, pe_ref, o_ref):
    # x_ref / o_ref: (tS, B, D); pe_ref: (tS, D). Broadcast over the batch axis.
    o_ref[...] = x_ref[...] + pe_ref[...][:, None, :]


# ----------------------------- pe buffer ----------------------------------- #

def make_positional_encoding(d_model, max_len=500, dtype=jnp.float32):
    """Module buffer: shape (max_len, 1, d_model); even lanes sin, odd lanes cos."""
    assert d_model % 2 == 0, "d_model must be even (same requirement as the PyTorch code)"
    position = jnp.arange(max_len, dtype=jnp.float32)[:, None]                 # (L, 1)
    div_term = jnp.exp(jnp.arange(0, d_model, 2, dtype=jnp.float32)
                       * (-math.log(10000.0) / d_model))                       # (D/2,)
    angles = position * div_term                                               # (L, D/2)
    pe = jnp.stack([jnp.sin(angles), jnp.cos(angles)], axis=-1)                # (L, D/2, 2)
    pe = pe.reshape(max_len, d_model)                                          # interleave sin/cos
    return pe[:, None, :].astype(dtype)                                        # (L, 1, D)


def fold_pe_for_batch(pe, batch):
    """Pre-tile the pe buffer over batch: (max_len, 1, D) -> (max_len, batch*D).
    Do this ONCE at model setup (buffer semantics) for the lane-dense 2D path."""
    max_len, _, d_model = pe.shape
    return jnp.tile(pe.reshape(max_len, d_model), (1, batch))


# ----------------------------- tiling -------------------------------------- #

_VMEM_LIMIT_BYTES = 48 * 1024 * 1024      # explicit scoped-VMEM ceiling (< 64 MiB v7x physical)
_WORKING_SET_BUDGET = 36 * 1024 * 1024    # double-buffered x + pe + out, at padded sizes


def _pick_seq_tile(S, padded_bytes_per_row, sublane):
    """Largest seq tile whose double-buffered *padded* working set fits the budget,
    rounded to a sublane multiple, with >= 2 grid blocks whenever S allows it
    (so the seq axis can shard across v7x's two TensorCores)."""
    tile = max(1, _WORKING_SET_BUDGET // max(padded_bytes_per_row, 1))
    if tile >= S:
        if S <= sublane:
            return S                       # single full-extent block
        tile = pl.cdiv(S, 2)               # force >= 2 blocks for megacore sharding
    tile = max(sublane, (tile // sublane) * sublane)
    return min(tile, S)


# ----------------------------- forward ------------------------------------- #

def positional_encoding_forward(x, pe, *, pe_folded=None, seq_tile=None):
    """x: (S, B, D) seq-first; pe: (max_len, 1, D) from make_positional_encoding.
    Returns x + pe[:S] broadcast over batch, same dtype as x."""
    S, B, D = x.shape
    max_len = pe.shape[0]
    assert S <= max_len and pe.shape[2] == D

    dtype = x.dtype
    itemsize = jnp.dtype(dtype).itemsize
    sublane = 8 * (4 // itemsize)          # f32: 8, bf16: 16 (packing), i8: 32

    compiler_params = pltpu.CompilerParams(
        dimension_semantics=("parallel",),          # independent seq blocks
        vmem_limit_bytes=_VMEM_LIMIT_BYTES)

    lane_dense_fold = (D % 128 != 0) or (B % sublane != 0)

    if lane_dense_fold:
        # ---- 2D path: (S, B*D) add against a pe table pre-tiled over batch ----
        lanes = B * D
        padded_lanes = pl.cdiv(lanes, 128) * 128
        # double-buffered x + pe + out rows, at their padded VMEM footprint
        padded_bytes_per_row = 2 * 3 * padded_lanes * itemsize
        if seq_tile is None:
            seq_tile = _pick_seq_tile(S, padded_bytes_per_row, sublane)
        if seq_tile >= S:
            seq_tile = S
        else:
            assert seq_tile % sublane == 0, "seq_tile must be a sublane multiple"

        if pe_folded is None:
            # Precompute once per (pe, batch) in real use (buffer semantics); under
            # jit this is hoisted/constant-folded since pe is a constant buffer.
            pe_folded = fold_pe_for_batch(pe, B)
        pe_folded = pe_folded.astype(dtype)
        assert pe_folded.shape == (max_len, lanes)

        x2 = x.reshape(S, lanes)                    # free contiguous reshape
        grid = (pl.cdiv(S, seq_tile),)
        out2 = pl.pallas_call(
            _posenc_kernel_2d,
            out_shape=jax.ShapeDtypeStruct((S, lanes), dtype),
            grid=grid,
            in_specs=[
                pl.BlockSpec((seq_tile, lanes), lambda i: (i, 0)),
                # pe rows are pulled straight out of the full (max_len, B*D) buffer.
                pl.BlockSpec((seq_tile, lanes), lambda i: (i, 0)),
            ],
            out_specs=pl.BlockSpec((seq_tile, lanes), lambda i: (i, 0)),
            compiler_params=compiler_params,
            cost_estimate=pl.CostEstimate(
                flops=S * lanes, transcendentals=0,
                bytes_accessed=3 * S * lanes * itemsize),
        )(x2, pe_folded)
        return out2.reshape(S, B, D)

    # ---- 3D path: B, D already (sublane, lane) aligned; pe read as (max_len, D) ----
    pe2d = pe.reshape(max_len, D).astype(dtype)     # drop the size-1 sublane dim (free)
    padded_bytes_per_row = 2 * (2 * B * D + D) * itemsize
    if seq_tile is None:
        seq_tile = _pick_seq_tile(S, padded_bytes_per_row, sublane)
    seq_tile = min(seq_tile, S)

    grid = (pl.cdiv(S, seq_tile),)
    return pl.pallas_call(
        _posenc_kernel_3d,
        out_shape=jax.ShapeDtypeStruct((S, B, D), dtype),
        grid=grid,
        in_specs=[
            pl.BlockSpec((seq_tile, B, D), lambda i: (i, 0, 0)),
            pl.BlockSpec((seq_tile, D), lambda i: (i, 0)),
        ],
        out_specs=pl.BlockSpec((seq_tile, B, D), lambda i: (i, 0, 0)),
        compiler_params=compiler_params,
        cost_estimate=pl.CostEstimate(
            flops=S * B * D, transcendentals=0,
            bytes_accessed=(2 * B + 1) * S * D * itemsize),
    )(x, pe2d)


def reference_forward(x, pe):
    """Pure-JAX reference matching the PyTorch forward pass."""
    return x + pe[: x.shape[0], :].astype(x.dtype)


if __name__ == "__main__":
    MAX_LEN = 500

    # Case 1: d_model < 128 -> lane-dense 2D fold path, pe pre-tiled once.
    S, B, D = 16, 2, 32
    key = jax.random.PRNGKey(0)
    x = jax.random.normal(key, (S, B, D), jnp.float32)
    pe = make_positional_encoding(D, MAX_LEN)
    pe_folded = fold_pe_for_batch(pe, B)            # buffer semantics: built once
    out = jax.block_until_ready(
        positional_encoding_forward(x, pe, pe_folded=pe_folded))
    assert out.shape == (S, B, D)
    assert jnp.allclose(out, reference_forward(x, pe), atol=1e-6, rtol=1e-6)

    # Case 2: ragged last block (S=24 with seq_tile=16 -> masked tail writes).
    x2 = jax.random.normal(jax.random.PRNGKey(1), (24, B, D), jnp.float32)
    out2 = jax.block_until_ready(
        positional_encoding_forward(x2, pe, pe_folded=pe_folded, seq_tile=16))
    assert jnp.allclose(out2, reference_forward(x2, pe), atol=1e-6, rtol=1e-6)

    # Case 3: lane/sublane-aligned shape -> 3D path (B on sublanes, D on lanes).
    S3, B3, D3 = 16, 8, 128
    pe3 = make_positional_encoding(D3, MAX_LEN)
    x3 = jax.random.normal(jax.random.PRNGKey(2), (S3, B3, D3), jnp.float32)
    out3 = jax.block_until_ready(positional_encoding_forward(x3, pe3))
    assert jnp.allclose(out3, reference_forward(x3, pe3), atol=1e-6, rtol=1e-6)

    print("KERNEL_OK")
</pallas_src>

<mosaic_0001>
module attributes {stable_mosaic.version = 11 : i64} {
  func.func @_posenc_kernel_2d(%arg0: i32, %arg1: memref<8x64xf32, #tpu.memory_space<vmem>>, %arg2: memref<8x64xf32, #tpu.memory_space<vmem>>, %arg3: memref<8x64xf32, #tpu.memory_space<vmem>>) attributes {dimension_semantics = [#tpu.dimension_semantics<parallel>], iteration_bounds = array<i64: 2>, scalar_prefetch = 0 : i64, scratch_operands = 0 : i64, tpu.core_type = #tpu.core_type<tc>, window_params = [{transform_indices = @transform_0, window_bounds = array<i64: 8, 64>}, {transform_indices = @transform_1, window_bounds = array<i64: 8, 64>}, {transform_indices = @transform_2, window_bounds = array<i64: 8, 64>}]} {
    %c0 = arith.constant 0 : index
    %c0_0 = arith.constant 0 : index
    %0 = vector.load %arg1[%c0, %c0_0] : memref<8x64xf32, #tpu.memory_space<vmem>>, vector<8x64xf32>
    %c0_1 = arith.constant 0 : index
    %c0_2 = arith.constant 0 : index
    %1 = vector.load %arg2[%c0_1, %c0_2] : memref<8x64xf32, #tpu.memory_space<vmem>>, vector<8x64xf32>
    %2 = arith.addf %0, %1 : vector<8x64xf32>
    %c0_3 = arith.constant 0 : index
    %c0_4 = arith.constant 0 : index
    %3 = vector.load %arg3[%c0_3, %c0_4] : memref<8x64xf32, #tpu.memory_space<vmem>>, vector<8x64xf32>
    tpu.vector_store %arg3[%c0_3, %c0_4], %2 {strides = array<i32>} : memref<8x64xf32, #tpu.memory_space<vmem>>, vector<8x64xf32>,
    return
  }
  func.func @transform_0(%arg0: i32) -> (i32, i32) {
    %c0_i32 = arith.constant 0 : i32
    %c0_i32_0 = arith.constant 0 : i32
    return %arg0, %c0_i32 : i32, i32
  }
  func.func @transform_1(%arg0: i32) -> (i32, i32) {
    %c0_i32 = arith.constant 0 : i32
    %c0_i32_0 = arith.constant 0 : i32
    return %arg0, %c0_i32 : i32, i32
  }
  func.func @transform_2(%arg0: i32) -> (i32, i32) {
    %c0_i32 = arith.constant 0 : i32
    %c0_i32_0 = arith.constant 0 : i32
    return %arg0, %c0_i32 : i32, i32
  }
}

</mosaic_0001>

<bundles_post_ra>
// kernel: tpu_custom_call.1
= control target key start
LH: loop header
LB: loop body
LE: loop exit
PB: predicated region body
PF: predicated region fallthrough
CT: control target
= control target key end

     0   :  { %7 = vsyncpa [#allocation3], 0  ;;  %s470_s0 = inlined_call_operand.vmem [shape: f32[16,64], index: 0, kind: input, shape index: {}]   ;;  %s471_s1 = inlined_call_operand.vmem [shape: f32[500,64], index: 1, kind: input, shape index: {}]   ;;  %s472_s2 = inlined_call_operand.hbm [shape: f32[16,64], index: 2, kind: output, shape index: {}]  }
   0x1   :  { %9 = vsyncpa [#allocation3 + $0x1], 0  ;;  %s377_s9 = smov 0   ;;  %s379_s10 = smov 0  }
   0x2   :  { %s381_s11 = smov 0   ;;  %s383_s12 = smov 0  }
   0x3 LB: > { %s398_s13 = sadd.s32 4294967295, %s360_s12   ;;  %s248_s14 = sadd.s32 4294967294, %s360_s12   ;;  %s360_s12 = sphi %s383_s12, %s478_s12   ;;  %s356_s11 = sphi %s381_s11, %s477_s11   ;;  %s352_s10 = sphi %s379_s10, %s476_s10   ;;  %s348_s9 = sphi %s377_s9, %s475_s9  }
   0x4   : > { %s402_s15 = sadd.s32 1, %s360_s12   ;;  %s74_s16 = sadd.s32 1, %s356_s11 }
   0x5   : > { %s71_s17 = ssub.s32 %s360_s12, %s402_s15  ;;  %p84_p0 = scmp.ne.s32.totalorder %s356_s11, %s352_s10 }
   0x6   : > { %p72_p1 = scmp.eq.s32.totalorder %s71_s17, 0  ;;  %p85_p2 = scmp.eq.s32.totalorder %s398_s13, 1 }
   0x7   : > { %p90_p3 = scmp.ne.s32.totalorder %s352_s10, %s348_s9  ;;  %p91_p4 = scmp.eq.s32.totalorder %s248_s14, 1 }
   0x8   : > { %s413_s18 = scalar_select %p72_p1, %s356_s11, %s74_s16  }
   0x9   : > { %p415_p5 = por %p85_p2, %p84_p0  ;;  %p419_p6 = por %p91_p4, %p90_p3 }
   0xa   : > { %p251_p7 = scmp.ge.s32.totalorder %s360_s12, 1  ;;  %p123_p8 = scmp.lt.s32.totalorder %s360_s12, 3 }
   0xc   : > { %p124_p9 = pnand %p251_p7, %p123_p8 }
   0xd   : > { %s145_s21 = sand.u32 (!%p124_p9), 1, %s352_s10   ;;  %p148_p10 = scmp.lt.s32.totalorder (!%p124_p9), %s398_s13, 1 }
   0xe   : > { %127 = sbr.rel (%p124_p9) target bundleno = 34 (0x22), region = 28  ;;  %s252_s22 = sshll.u32 (!%p124_p9), %s145_s21, 3 }
   0xf   : > { %p152_p11 = scmp.lt.s32.totalorder (!%p124_p9), %s398_s13, 62  ;;  %s147_s26 = scalar_lea.vmem (!%p124_p9), [#allocation2], %s252_s22 }
  0x10   : > { %s430_s27 = sshll.u32 (!%p124_p9), %s147_s26, 4  ;;  %s256_s7 = sshll.u32 (!%p124_p9), %s398_s13, 3  ;;  %s175_s27 = int_to_ptr.vmem [resolvable:$true] %s430_s27 }
  0x11   : > { %s172_s16 = scalar_lea.hbm (!%p124_p9), %s472_s2, %s256_s7  ;;  %s162_s22 = scalar_lea.sflag (!%p124_p9), [#allocation3], %s145_s21 }
  0x12   : > { %s176_s17 = sshll.u32 (!%p124_p9), %s172_s16, 4  ;;  %s177_s17 = int_to_ptr.hbm [resolvable:$true] %s176_s17 }
  0x13   : > { %s149_s23 = scalar_select %p148_p10, %s398_s13, 1  ;;  %vm159_vm0 = vcmask 523264  }
  0x14   : > { %s153_s24 = scalar_select %p152_p11, %s398_s13, 62 }
  0x15   : > { %s253_s25 = sshll.u32 %s149_s23, 3  ;;  %s312_s23 = sshra.s32 %s177_s17, 4  ;;  %s313_s23 = int_to_ptr.hbm [resolvable:$true] %s312_s23 }
  0x16   : > { %s151_s30 = scalar_lea.vmem %s470_s0, %s253_s25  ;;  %s254_s3 = sshll.u32 %s153_s24, 3 }
  0x17   : > { %s155_s6 = scalar_lea.vmem %s471_s1, %s254_s3  ;;  %v156_v0 = vld [vmem:[%s151_s30] sm:$0xff]  ;;  %s314_s24 = scalar_lea.hbm %s313_s23, 8 }
  0x18   : > { %v157_v1 = vld [vmem:[%s155_s6] sm:$0xff]  ;;  %p315_p12 = scmp.ne.s32.totalorder %s313_s23, %s314_s24  ;;  %s318_s13 = scalar_lea.hbm %s472_s2, 16 }
  0x19   : > { %v158_v2 = vadd.f32 %v157_v1, %v156_v0  ;;  %p319_p1 = scmp.lt.s32.totalorder %s313_s23, %s472_s2  ;;  %p320_p2 = scmp.lt.s32.totalorder %s318_s13, %s314_s24 }
  0x1a   : > { %p316_p13 = pnand %p315_p12, %p415_p5 }
  0x1b   : > { %160 = vst.msk [vmem:[%s147_s26] sm:$0xff] %vm159_vm0, %v158_v2  ;;  %p321_p3 = por %p320_p2, %p319_p1 }
  0x1c   : > { %p317_p0 = pneg %p316_p13 }
  0x1e   : > { %p322_p4 = pnand %p321_p3, %p317_p0 }
  0x20   : > { %325 = shalt.err (!%p322_p4)
}
  0x21   : > { %259 = dma.vmem_to_hbm [thread:$0]  (%p415_p5), %s175_s27, 128, %s177_s17, %s162_s22  }
  0x22 PF: > { %p265_p7 = scmp.ge.s32.totalorder %s360_s12, 2  ;;  %s188_s21 = sand.u32 1, %s348_s9  }
  0x23   : > { %s189_s26 = scalar_lea.sflag [#allocation3], %s188_s21 }
  0x24   : > { %p262_p8 = pnand %p265_p7, %p419_p6 }
  0x26   : > { %p263_p9 = pneg %p262_p8 }
  0x28   : > { %343 = dma.done.wait (%p263_p9), %s189_s26, 128  }
  0x29   : > { %345 = vsyncadd (%p263_p9), %s189_s26, 4294967168  ;;  %p12_p10 = scmp.ge.s32.totalorder %s402_s15, 4   ;;  %s475_s9 = smov %s352_s10 }
  0x2a   : > { %s476_s10 = smov %s356_s11  ;;  %s477_s11 = smov %s413_s18 }
  0x2b   : > { %s478_s12 = smov %s402_s15  ;;  %14 = sbr.rel (!%p12_p10) target bundleno = 3 (0x3), region = 66 }
  0x30   :  { %195 = vsyncpa [#allocation3], 1 }
  0x31   :  { %197 = vsyncpa [#allocation3 + $0x1], 1 }

</bundles_post_ra>
